<compile_context>
chip_gen: v5e
topology: v5e:2x2
jax: 0.10.0
libtpu: 0.0.40
codegen_flags: <defaults>
</compile_context>

<pallas_src>
import functools

import jax
import jax.numpy as jnp
from jax.experimental import pallas as pl
from jax.experimental.pallas import tpu as pltpu

_SUBLANE = 8


def _mha_kernel(x_ref, w_ref, b_ref, o_ref, *, n_heads, dim_heads, n_valid):
    """One grid step = `bb` batch elements.

    x_ref : (bb, Np, D)  input activations (f32, cast to bf16 for the MXU)
    w_ref : (D, 3D)      bf16 fused [Wq*scale | Wk | Wv], resident across steps
    b_ref : (1, 3D)      f32  fused [bq*scale | bk | bv]
    o_ref : (bb, Np, D)
    """
    bb, N, D = x_ref.shape
    H, d = n_heads, dim_heads

    # Fused QKV projection: one wide bf16 MXU matmul, f32 accumulation.
    x2d = x_ref[...].reshape(bb * N, D).astype(jnp.bfloat16)
    qkv = jnp.dot(x2d, w_ref[...], preferred_element_type=jnp.float32) + b_ref[...]
    qkv = qkv.astype(jnp.bfloat16).reshape(bb, N, 3 * D)

    # Key-side mask for sequence padding (built only when padding exists).
    if n_valid < N:
        key_ids = jax.lax.broadcasted_iota(jnp.int32, (1, 1, N), 2)
        neg = jnp.where(key_ids < n_valid, 0.0, -1e30).astype(jnp.float32)
    else:
        neg = None

    # Short head loop stays unrolled; the batch-block dim is a batched
    # dot_general (no Python loop over batch elements).
    head_outs = []
    for h in range(H):
        lo = h * d
        q = qkv[:, :, lo:lo + d]                    # (bb, N, d); scale folded into W
        k = qkv[:, :, D + lo:D + lo + d]
        v = qkv[:, :, 2 * D + lo:2 * D + lo + d]

        logits = jnp.einsum("bnd,bmd->bnm", q, k,
                            preferred_element_type=jnp.float32)   # (bb, N, N)
        if neg is not None:
            logits = logits + neg

        # Numerically stable, exact softmax (review correctness note).
        m = jnp.max(logits, axis=-1, keepdims=True)
        p = jnp.exp(logits - m)
        attn = p / jnp.sum(p, axis=-1, keepdims=True)

        head_outs.append(
            jnp.einsum("bnm,bmd->bnd", attn.astype(jnp.bfloat16), v,
                       preferred_element_type=jnp.float32))        # (bb, N, d)

    # Single full-width (bb, N, D) store per grid step.
    o_ref[...] = jnp.concatenate(head_outs, axis=-1).astype(o_ref.dtype)


def prepare_qkv_params(wq, bq, wk, bk, wv, bv, *, n_heads,
                       weight_dtype=jnp.bfloat16):
    """One-time parameter prep (hoisted out of the forward pass).

    Fuses Wq|Wk|Wv into a single (D, 3D) matrix (one wide MXU matmul, one
    weight DMA) and folds the 1/sqrt(d_head) attention scale into the Q
    columns and bq. Weights are cast to bf16 for the MXU; biases stay f32.
    """
    D = wq.shape[0]
    assert D % n_heads == 0
    scale = (D // n_heads) ** (-0.5)
    w_qkv = jnp.concatenate([wq * scale, wk, wv], axis=1).astype(weight_dtype)
    b_qkv = jnp.concatenate([bq * scale, bk, bv], axis=1).astype(jnp.float32)
    return w_qkv, b_qkv


def _vmem_capacity_bytes():
    try:
        return int(pltpu.get_tpu_info().vmem_capacity_bytes)
    except Exception:
        return 64 << 20        # conservative default (v7x per-core VMEM)


def _step_vmem_bytes(bb, N, D, H):
    """Rough per-grid-step VMEM footprint used to size batch_block."""
    io = 2 * 2 * bb * N * D * 4             # x + out blocks, double buffered (f32)
    wgt = 2 * (D * 3 * D * 2 + 3 * D * 4)   # resident bf16 W_qkv + f32 bias (slack x2)
    qkv = bb * N * 3 * D * 2                # bf16 projection value
    att = bb * H * N * N * 10               # logits(f32) + exp(f32) + attn(bf16)
    outs = 2 * bb * N * D * 4               # per-head outputs + concat
    return io + wgt + qkv + att + outs


def _choose_batch_block(B, N, D, H, vmem_cap):
    budget = vmem_cap // 3                  # headroom for compiler scratch / spills
    min_steps = min(B, 4)                   # keep >=4 grid steps for DMA/compute overlap
    best = 1
    for cand in range(1, B + 1):
        if B % cand:
            continue
        if B // cand < min_steps:
            break
        if _step_vmem_bytes(cand, N, D, H) <= budget:
            best = cand
    return best


def multi_head_attention(x, w_qkv, b_qkv, *, n_heads, batch_block=None):
    """x: (B, N, D) f32; w_qkv: (D, 3D) fused [Wq*scale|Wk|Wv]; b_qkv: (1, 3D)."""
    B, N, D = x.shape
    assert D % n_heads == 0
    dim_heads = D // n_heads
    assert w_qkv.shape == (D, 3 * D) and b_qkv.shape == (1, 3 * D)

    # Pad the sequence to a sublane multiple so in-kernel reshapes stay
    # layout no-ops (e.g. real ViT N=197); padded keys are masked in softmax.
    Np = ((N + _SUBLANE - 1) // _SUBLANE) * _SUBLANE
    if Np != N:
        x = jnp.pad(x, ((0, 0), (0, Np - N), (0, 0)))

    vmem_cap = _vmem_capacity_bytes()
    if batch_block is None:
        batch_block = _choose_batch_block(B, Np, D, n_heads, vmem_cap)
    batch_block = max(1, min(int(batch_block), B))
    while B % batch_block:
        batch_block -= 1

    vmem_limit = int(min(vmem_cap,
                         max(32 << 20,
                             2 * _step_vmem_bytes(batch_block, Np, D, n_heads))))

    kernel = functools.partial(_mha_kernel, n_heads=n_heads,
                               dim_heads=dim_heads, n_valid=N)

    grid_spec = pltpu.PrefetchScalarGridSpec(
        num_scalar_prefetch=0,
        grid=(B // batch_block,),
        in_specs=[
            pl.BlockSpec((batch_block, Np, D), lambda i: (i, 0, 0)),   # x
            # Constant index_map -> weight/bias blocks stay resident in VMEM.
            pl.BlockSpec((D, 3 * D), lambda i: (0, 0)),                # W_qkv
            pl.BlockSpec((1, 3 * D), lambda i: (0, 0)),                # b_qkv
        ],
        out_specs=pl.BlockSpec((batch_block, Np, D), lambda i: (i, 0, 0)),
    )

    out = pl.pallas_call(
        kernel,
        out_shape=jax.ShapeDtypeStruct((B, Np, D), x.dtype),
        grid_spec=grid_spec,
        compiler_params=pltpu.CompilerParams(
            dimension_semantics=("parallel",),
            vmem_limit_bytes=vmem_limit),
    )(x, w_qkv, b_qkv)

    return out[:, :N, :] if Np != N else out


def _reference(x, wq, bq, wk, bk, wv, bv, n_heads):
    """Pure-JAX f32 reference mirroring the PyTorch forward."""
    B, N, D = x.shape
    d = D // n_heads
    q = x @ wq + bq
    k = x @ wk + bk
    v = x @ wv + bv

    def split(t):  # b n (h d) -> b h n d
        return t.reshape(B, N, n_heads, d).transpose(0, 2, 1, 3)

    q, k, v = split(q), split(k), split(v)
    logit = jnp.einsum("bhnd,bhmd->bhnm", q, k) * (d ** -0.5)
    attn = jax.nn.softmax(logit, axis=-1)
    out = jnp.einsum("bhnm,bhmd->bhnd", attn, v)
    return out.transpose(0, 2, 1, 3).reshape(B, N, D)  # b h n d -> b n (h d)


if __name__ == "__main__":
    # Small shapes implied by the module: batch=2, n_patches+1=8, vec_length=32
    B, N, D = 2, 8, 32
    n_heads = 4

    key = jax.random.PRNGKey(0)
    kx, kwq, kbq, kwk, kbk, kwv, kbv = jax.random.split(key, 7)

    x = jax.random.normal(kx, (B, N, D), dtype=jnp.float32)

    # Linear params (y = x @ W + b, W stored as [in, out])
    scale = 1.0 / jnp.sqrt(D)
    wq = jax.random.uniform(kwq, (D, D), jnp.float32, -scale, scale)
    wk = jax.random.uniform(kwk, (D, D), jnp.float32, -scale, scale)
    wv = jax.random.uniform(kwv, (D, D), jnp.float32, -scale, scale)
    bq = jax.random.uniform(kbq, (1, D), jnp.float32, -scale, scale)
    bk = jax.random.uniform(kbk, (1, D), jnp.float32, -scale, scale)
    bv = jax.random.uniform(kbv, (1, D), jnp.float32, -scale, scale)

    # One-time parameter prep (fusion + scale folding hoisted out of forward).
    w_qkv, b_qkv = prepare_qkv_params(wq, bq, wk, bk, wv, bv, n_heads=n_heads)

    out = multi_head_attention(x, w_qkv, b_qkv, n_heads=n_heads)
    out = jax.block_until_ready(out)

    ref = _reference(x, wq, bq, wk, bk, wv, bv, n_heads)
    assert out.shape == (B, N, D)
    err = float(jnp.max(jnp.abs(out - ref)))
    # Softmax normalization is exact; remaining error comes from bf16 MXU
    # operands (with f32 accumulation), per the performance review.
    assert err < 3e-2, f"max abs err = {err}"

    print("KERNEL_OK")
</pallas_src>

<mosaic_0001>
module attributes {stable_mosaic.version = 11 : i64} {
  func.func @_mha_kernel(%arg0: i32, %arg1: memref<1x8x32xf32, #tpu.memory_space<vmem>>, %arg2: memref<32x96xbf16, #tpu.memory_space<vmem>>, %arg3: memref<1x96xf32, #tpu.memory_space<vmem>>, %arg4: memref<1x8x32xf32, #tpu.memory_space<vmem>>) attributes {dimension_semantics = [#tpu.dimension_semantics<parallel>], iteration_bounds = array<i64: 2>, scalar_prefetch = 0 : i64, scratch_operands = 0 : i64, tpu.core_type = #tpu.core_type<tc>, window_params = [{transform_indices = @transform_0, window_bounds = array<i64: 1, 8, 32>}, {pipeline_mode = #tpu.pipeline_mode<synchronous>, transform_indices = @transform_1, window_bounds = array<i64: 32, 96>}, {pipeline_mode = #tpu.pipeline_mode<synchronous>, transform_indices = @transform_2, window_bounds = array<i64: 1, 96>}, {transform_indices = @transform_3, window_bounds = array<i64: 1, 8, 32>}]} {
    %c0 = arith.constant 0 : index
    %c0_0 = arith.constant 0 : index
    %c0_1 = arith.constant 0 : index
    %0 = vector.load %arg1[%c0, %c0_0, %c0_1] : memref<1x8x32xf32, #tpu.memory_space<vmem>>, vector<1x8x32xf32>
    %1 = vector.shape_cast %0 : vector<1x8x32xf32> to vector<8x32xf32>
    %2 = arith.truncf %1 : vector<8x32xf32> to vector<8x32xbf16>
    %c0_2 = arith.constant 0 : index
    %c0_3 = arith.constant 0 : index
    %3 = vector.load %arg2[%c0_2, %c0_3] : memref<32x96xbf16, #tpu.memory_space<vmem>>, vector<32x96xbf16>
    %cst = arith.constant dense<0.000000e+00> : vector<8x96xf32>
    %4 = tpu.matmul %2, %3, %cst {dimension_numbers = #tpu.dot_dimension_numbers<[1], [0], [0], [1], [0, 0, 1, 1], [], []>} : vector<8x32xbf16>, vector<32x96xbf16>, vector<8x96xf32> -> vector<8x96xf32>
    %c0_4 = arith.constant 0 : index
    %c0_5 = arith.constant 0 : index
    %5 = vector.load %arg3[%c0_4, %c0_5] : memref<1x96xf32, #tpu.memory_space<vmem>>, vector<1x96xf32>
    %6 = vector.broadcast %5 : vector<1x96xf32> to vector<8x96xf32>
    %7 = arith.addf %4, %6 : vector<8x96xf32>
    %8 = arith.truncf %7 : vector<8x96xf32> to vector<8x96xbf16>
    %9 = vector.shape_cast %8 : vector<8x96xbf16> to vector<1x8x96xbf16>
    %10 = vector.extract_strided_slice %9 {offsets = [0, 0, 0], sizes = [1, 8, 8], strides = [1, 1, 1]} : vector<1x8x96xbf16> to vector<1x8x8xbf16>
    %11 = vector.extract_strided_slice %9 {offsets = [0, 0, 32], sizes = [1, 8, 8], strides = [1, 1, 1]} : vector<1x8x96xbf16> to vector<1x8x8xbf16>
    %12 = vector.extract_strided_slice %9 {offsets = [0, 0, 64], sizes = [1, 8, 8], strides = [1, 1, 1]} : vector<1x8x96xbf16> to vector<1x8x8xbf16>
    "tpu.trace_start"() <{level = 10 : i32, message = "bnd,bmd->bnm"}> : () -> ()
    %cst_6 = arith.constant dense<0.000000e+00> : vector<1x8x8xf32>
    %13 = tpu.matmul %10, %11, %cst_6 {dimension_numbers = #tpu.dot_dimension_numbers<[2], [2], [1], [1], [0, 0, 0, 1, 1, 1], [0], [0]>} : vector<1x8x8xbf16>, vector<1x8x8xbf16>, vector<1x8x8xf32> -> vector<1x8x8xf32>
    "tpu.trace_stop"() : () -> ()
    %cst_7 = arith.constant dense<0xFF800000> : vector<1x8xf32>
    %14 = vector.multi_reduction <maximumf>, %13, %cst_7 [2] : vector<1x8x8xf32> to vector<1x8xf32>
    %15 = vector.shape_cast %14 : vector<1x8xf32> to vector<1x8x1xf32>
    %16 = vector.broadcast %15 : vector<1x8x1xf32> to vector<1x8x8xf32>
    %17 = arith.subf %13, %16 : vector<1x8x8xf32>
    %18 = math.exp %17 : vector<1x8x8xf32>
    %cst_8 = arith.constant dense<0.000000e+00> : vector<1x8xf32>
    %19 = vector.multi_reduction <add>, %18, %cst_8 [2] : vector<1x8x8xf32> to vector<1x8xf32>
    %20 = vector.shape_cast %19 : vector<1x8xf32> to vector<1x8x1xf32>
    %21 = vector.broadcast %20 : vector<1x8x1xf32> to vector<1x8x8xf32>
    %22 = arith.divf %18, %21 : vector<1x8x8xf32>
    %23 = arith.truncf %22 : vector<1x8x8xf32> to vector<1x8x8xbf16>
    "tpu.trace_start"() <{level = 10 : i32, message = "bnm,bmd->bnd"}> : () -> ()
    %cst_9 = arith.constant dense<0.000000e+00> : vector<1x8x8xf32>
    %24 = tpu.matmul %23, %12, %cst_9 {dimension_numbers = #tpu.dot_dimension_numbers<[2], [1], [1], [2], [0, 0, 0, 1, 1, 2], [0], [0]>} : vector<1x8x8xbf16>, vector<1x8x8xbf16>, vector<1x8x8xf32> -> vector<1x8x8xf32>
    "tpu.trace_stop"() : () -> ()
    %25 = vector.extract_strided_slice %9 {offsets = [0, 0, 8], sizes = [1, 8, 8], strides = [1, 1, 1]} : vector<1x8x96xbf16> to vector<1x8x8xbf16>
    %26 = vector.extract_strided_slice %9 {offsets = [0, 0, 40], sizes = [1, 8, 8], strides = [1, 1, 1]} : vector<1x8x96xbf16> to vector<1x8x8xbf16>
    %27 = vector.extract_strided_slice %9 {offsets = [0, 0, 72], sizes = [1, 8, 8], strides = [1, 1, 1]} : vector<1x8x96xbf16> to vector<1x8x8xbf16>
    "tpu.trace_start"() <{level = 10 : i32, message = "bnd,bmd->bnm"}> : () -> ()
    %cst_10 = arith.constant dense<0.000000e+00> : vector<1x8x8xf32>
    %28 = tpu.matmul %25, %26, %cst_10 {dimension_numbers = #tpu.dot_dimension_numbers<[2], [2], [1], [1], [0, 0, 0, 1, 1, 1], [0], [0]>} : vector<1x8x8xbf16>, vector<1x8x8xbf16>, vector<1x8x8xf32> -> vector<1x8x8xf32>
    "tpu.trace_stop"() : () -> ()
    %cst_11 = arith.constant dense<0xFF800000> : vector<1x8xf32>
    %29 = vector.multi_reduction <maximumf>, %28, %cst_11 [2] : vector<1x8x8xf32> to vector<1x8xf32>
    %30 = vector.shape_cast %29 : vector<1x8xf32> to vector<1x8x1xf32>
    %31 = vector.broadcast %30 : vector<1x8x1xf32> to vector<1x8x8xf32>
    %32 = arith.subf %28, %31 : vector<1x8x8xf32>
    %33 = math.exp %32 : vector<1x8x8xf32>
    %cst_12 = arith.constant dense<0.000000e+00> : vector<1x8xf32>
    %34 = vector.multi_reduction <add>, %33, %cst_12 [2] : vector<1x8x8xf32> to vector<1x8xf32>
    %35 = vector.shape_cast %34 : vector<1x8xf32> to vector<1x8x1xf32>
    %36 = vector.broadcast %35 : vector<1x8x1xf32> to vector<1x8x8xf32>
    %37 = arith.divf %33, %36 : vector<1x8x8xf32>
    %38 = arith.truncf %37 : vector<1x8x8xf32> to vector<1x8x8xbf16>
    "tpu.trace_start"() <{level = 10 : i32, message = "bnm,bmd->bnd"}> : () -> ()
    %cst_13 = arith.constant dense<0.000000e+00> : vector<1x8x8xf32>
    %39 = tpu.matmul %38, %27, %cst_13 {dimension_numbers = #tpu.dot_dimension_numbers<[2], [1], [1], [2], [0, 0, 0, 1, 1, 2], [0], [0]>} : vector<1x8x8xbf16>, vector<1x8x8xbf16>, vector<1x8x8xf32> -> vector<1x8x8xf32>
    "tpu.trace_stop"() : () -> ()
    %40 = vector.extract_strided_slice %9 {offsets = [0, 0, 16], sizes = [1, 8, 8], strides = [1, 1, 1]} : vector<1x8x96xbf16> to vector<1x8x8xbf16>
    %41 = vector.extract_strided_slice %9 {offsets = [0, 0, 48], sizes = [1, 8, 8], strides = [1, 1, 1]} : vector<1x8x96xbf16> to vector<1x8x8xbf16>
    %42 = vector.extract_strided_slice %9 {offsets = [0, 0, 80], sizes = [1, 8, 8], strides = [1, 1, 1]} : vector<1x8x96xbf16> to vector<1x8x8xbf16>
    "tpu.trace_start"() <{level = 10 : i32, message = "bnd,bmd->bnm"}> : () -> ()
    %cst_14 = arith.constant dense<0.000000e+00> : vector<1x8x8xf32>
    %43 = tpu.matmul %40, %41, %cst_14 {dimension_numbers = #tpu.dot_dimension_numbers<[2], [2], [1], [1], [0, 0, 0, 1, 1, 1], [0], [0]>} : vector<1x8x8xbf16>, vector<1x8x8xbf16>, vector<1x8x8xf32> -> vector<1x8x8xf32>
    "tpu.trace_stop"() : () -> ()
    %cst_15 = arith.constant dense<0xFF800000> : vector<1x8xf32>
    %44 = vector.multi_reduction <maximumf>, %43, %cst_15 [2] : vector<1x8x8xf32> to vector<1x8xf32>
    %45 = vector.shape_cast %44 : vector<1x8xf32> to vector<1x8x1xf32>
    %46 = vector.broadcast %45 : vector<1x8x1xf32> to vector<1x8x8xf32>
    %47 = arith.subf %43, %46 : vector<1x8x8xf32>
    %48 = math.exp %47 : vector<1x8x8xf32>
    %cst_16 = arith.constant dense<0.000000e+00> : vector<1x8xf32>
    %49 = vector.multi_reduction <add>, %48, %cst_16 [2] : vector<1x8x8xf32> to vector<1x8xf32>
    %50 = vector.shape_cast %49 : vector<1x8xf32> to vector<1x8x1xf32>
    %51 = vector.broadcast %50 : vector<1x8x1xf32> to vector<1x8x8xf32>
    %52 = arith.divf %48, %51 : vector<1x8x8xf32>
    %53 = arith.truncf %52 : vector<1x8x8xf32> to vector<1x8x8xbf16>
    "tpu.trace_start"() <{level = 10 : i32, message = "bnm,bmd->bnd"}> : () -> ()
    %cst_17 = arith.constant dense<0.000000e+00> : vector<1x8x8xf32>
    %54 = tpu.matmul %53, %42, %cst_17 {dimension_numbers = #tpu.dot_dimension_numbers<[2], [1], [1], [2], [0, 0, 0, 1, 1, 2], [0], [0]>} : vector<1x8x8xbf16>, vector<1x8x8xbf16>, vector<1x8x8xf32> -> vector<1x8x8xf32>
    "tpu.trace_stop"() : () -> ()
    %55 = vector.extract_strided_slice %9 {offsets = [0, 0, 24], sizes = [1, 8, 8], strides = [1, 1, 1]} : vector<1x8x96xbf16> to vector<1x8x8xbf16>
    %56 = vector.extract_strided_slice %9 {offsets = [0, 0, 56], sizes = [1, 8, 8], strides = [1, 1, 1]} : vector<1x8x96xbf16> to vector<1x8x8xbf16>
    %57 = vector.extract_strided_slice %9 {offsets = [0, 0, 88], sizes = [1, 8, 8], strides = [1, 1, 1]} : vector<1x8x96xbf16> to vector<1x8x8xbf16>
    "tpu.trace_start"() <{level = 10 : i32, message = "bnd,bmd->bnm"}> : () -> ()
    %cst_18 = arith.constant dense<0.000000e+00> : vector<1x8x8xf32>
    %58 = tpu.matmul %55, %56, %cst_18 {dimension_numbers = #tpu.dot_dimension_numbers<[2], [2], [1], [1], [0, 0, 0, 1, 1, 1], [0], [0]>} : vector<1x8x8xbf16>, vector<1x8x8xbf16>, vector<1x8x8xf32> -> vector<1x8x8xf32>
    "tpu.trace_stop"() : () -> ()
    %cst_19 = arith.constant dense<0xFF800000> : vector<1x8xf32>
    %59 = vector.multi_reduction <maximumf>, %58, %cst_19 [2] : vector<1x8x8xf32> to vector<1x8xf32>
    %60 = vector.shape_cast %59 : vector<1x8xf32> to vector<1x8x1xf32>
    %61 = vector.broadcast %60 : vector<1x8x1xf32> to vector<1x8x8xf32>
    %62 = arith.subf %58, %61 : vector<1x8x8xf32>
    %63 = math.exp %62 : vector<1x8x8xf32>
    %cst_20 = arith.constant dense<0.000000e+00> : vector<1x8xf32>
    %64 = vector.multi_reduction <add>, %63, %cst_20 [2] : vector<1x8x8xf32> to vector<1x8xf32>
    %65 = vector.shape_cast %64 : vector<1x8xf32> to vector<1x8x1xf32>
    %66 = vector.broadcast %65 : vector<1x8x1xf32> to vector<1x8x8xf32>
    %67 = arith.divf %63, %66 : vector<1x8x8xf32>
    %68 = arith.truncf %67 : vector<1x8x8xf32> to vector<1x8x8xbf16>
    "tpu.trace_start"() <{level = 10 : i32, message = "bnm,bmd->bnd"}> : () -> ()
    %cst_21 = arith.constant dense<0.000000e+00> : vector<1x8x8xf32>
    %69 = tpu.matmul %68, %57, %cst_21 {dimension_numbers = #tpu.dot_dimension_numbers<[2], [1], [1], [2], [0, 0, 0, 1, 1, 2], [0], [0]>} : vector<1x8x8xbf16>, vector<1x8x8xbf16>, vector<1x8x8xf32> -> vector<1x8x8xf32>
    "tpu.trace_stop"() : () -> ()
    %70 = tpu.concatenate %24, %39, %54, %69 in 2 : vector<1x8x8xf32>, vector<1x8x8xf32>, vector<1x8x8xf32>, vector<1x8x8xf32> -> vector<1x8x32xf32>
    %c0_22 = arith.constant 0 : index
    %c0_23 = arith.constant 0 : index
    %c0_24 = arith.constant 0 : index
    %71 = vector.load %arg4[%c0_22, %c0_23, %c0_24] : memref<1x8x32xf32, #tpu.memory_space<vmem>>, vector<1x8x32xf32>
    tpu.vector_store %arg4[%c0_22, %c0_23, %c0_24], %70 {strides = array<i32>} : memref<1x8x32xf32, #tpu.memory_space<vmem>>, vector<1x8x32xf32>,
    return
  }
  func.func @transform_0(%arg0: i32) -> (i32, i32, i32) {
    %c0_i32 = arith.constant 0 : i32
    %c0_i32_0 = arith.constant 0 : i32
    %c0_i32_1 = arith.constant 0 : i32
    return %arg0, %c0_i32, %c0_i32_0 : i32, i32, i32
  }
  func.func @transform_1(%arg0: i32) -> (i32, i32) {
    %c0_i32 = arith.constant 0 : i32
    %c0_i32_0 = arith.constant 0 : i32
    %c0_i32_1 = arith.constant 0 : i32
    return %c0_i32, %c0_i32_0 : i32, i32
  }
  func.func @transform_2(%arg0: i32) -> (i32, i32) {
    %c0_i32 = arith.constant 0 : i32
    %c0_i32_0 = arith.constant 0 : i32
    %c0_i32_1 = arith.constant 0 : i32
    return %c0_i32, %c0_i32_0 : i32, i32
  }
  func.func @transform_3(%arg0: i32) -> (i32, i32, i32) {
    %c0_i32 = arith.constant 0 : i32
    %c0_i32_0 = arith.constant 0 : i32
    %c0_i32_1 = arith.constant 0 : i32
    return %arg0, %c0_i32, %c0_i32_0 : i32, i32, i32
  }
}

</mosaic_0001>

<bundles_post_ra>
// kernel: tpu_custom_call.1
= control target key start
LH: loop header
LB: loop body
LE: loop exit
PB: predicated region body
PF: predicated region fallthrough
CT: control target
= control target key end

     0   :  { %8 = vsyncpa [#allocation3], 0  ;;  %s1126_s0 = inlined_call_operand.hbm [shape: f32[2,8,32], index: 0, kind: input, shape index: {}]   ;;  %s1127_s1 = inlined_call_operand.hbm [shape: bf16[32,96], index: 1, kind: input, shape index: {}]   ;;  %s1128_s2 = inlined_call_operand.vmem [shape: f32[1,96], index: 2, kind: input, shape index: {}]   ;;  %s1129_s3 = inlined_call_operand.hbm [shape: f32[2,8,32], index: 3, kind: output, shape index: {}]  }
   0x1   :  { %10 = vsyncpa [#allocation3 + $0x1], 0 }
   0x2   :  { %11 = vsyncpa [#allocation6], 0 }
   0x3   :  { %12 = vsyncpa [#allocation4], 0 }
   0x4   :  { %14 = vsyncpa [#allocation4 + $0x1], 0  ;;  %s931_s12 = smov 0   ;;  %s933_s13 = smov 0  }
   0x5   :  { %s935_s14 = smov 0   ;;  %s937_s15 = smov 0  }
   0x6 LB: > { %s130_s18 = sshll.u32 %s1127_s1, 4  ;;  %s955_s19 = sadd.s32 4294967295, %s892_s15   ;;  %s892_s15 = sphi %s937_s15, %s1139_s15   ;;  %s888_s14 = sphi %s935_s14, %s1138_s14   ;;  %s884_s13 = sphi %s933_s13, %s1137_s13   ;;  %s880_s12 = sphi %s931_s12, %s1136_s12   ;;  %s131_s18 = int_to_ptr.hbm [resolvable:$true] %s130_s18 }
   0x7   : > { %p640_p0 = scmp.ge.s32.totalorder %s892_s15, 1  ;;  %p41_p1 = scmp.eq.s32.totalorder %s955_s19, 0 }
   0x8   : > { %p119_p2 = scmp.lt.s32.totalorder %s892_s15, 3  ;;  %s894_s21 = smov [#allocation5]  }
   0x9   : > { %s132_s22 = sshll.u32 %s894_s21, 4  ;;  %s895_s23 = smov 64   ;;  %s133_s22 = int_to_ptr.vmem [resolvable:$true] %s132_s22 }
   0xa   : > { %p960_p3 = pnand %p640_p0, %p119_p2  ;;  %s896_s24 = smov 4  }
   0xb   : > { %s639_s25 = sadd.s32 4294967294, %s892_s15   ;;  %s971_s26 = sadd.s32 1, %s892_s15  }
   0xc   : > { %p680_p4 = pneg %p960_p3  ;;  %s27_s27 = sadd.s32 1, %s888_s14 }
   0xd   : > { %s24_s28 = ssub.s32 %s892_s15, %s971_s26  ;;  %p34_p7 = scmp.ne.s32.totalorder %s888_s14, %s884_s13 }
   0xe   : > { %p681_p6 = pnand %p680_p4, %p41_p1  ;;  %p25_p8 = scmp.eq.s32.totalorder %s24_s28, 0 }
   0xf   : > { %p35_p9 = scmp.eq.s32.totalorder %s892_s15, 0  ;;  %p40_p10 = scmp.ne.s32.totalorder %s884_s13, %s880_s12 }
  0x10   : > { %683 = dma.hbm_to_vmem [thread:$0]  (!%p681_p6), %s131_s18, 256, %s133_s22, [#allocation6], %s895_s23, %s895_s23, %s896_s24  }
  0x11   : > { %p106_p11 = scmp.eq.s32.totalorder %s955_s19, 1  ;;  %p987_p12 = por %p41_p1, %p40_p10 }
  0x12   : > { %s983_s29 = scalar_select %p25_p8, %s888_s14, %s27_s27  }
  0x13   : > { %p991_p13 = por %p106_p11, %p34_p7  ;;  %p112_p0 = scmp.eq.s32.totalorder %s639_s25, 1 }
  0x14   : > { %p36_p2 = por %p35_p9, %p34_p7  ;;  %s149_s5 = sand.u32 1, %s888_s14  }
  0x15   : > { %p996_p4 = por %p112_p0, %p40_p10  ;;  %p693_p6 = scmp.lt.s32.totalorder %s892_s15, 2 }
  0x16   : > { %s643_s7 = sshll.u32 %s149_s5, 3  ;;  %s644_s8 = sshll.u32 %s892_s15, 3 }
  0x17   : > { %s157_s11 = scalar_lea.hbm %s1126_s0, %s644_s8  ;;  %s153_s17 = scalar_lea.vmem [#allocation2], %s643_s7 }
  0x18   : > { %s159_s16 = sshll.u32 %s157_s11, 4  ;;  %s161_s18 = sshll.u32 %s153_s17, 4  ;;  %s160_s16 = int_to_ptr.hbm [resolvable:$true] %s159_s16  ;;  %s162_s18 = int_to_ptr.vmem [resolvable:$true] %s161_s18 }
  0x19   : > { %p1005_p8 = pnand %p693_p6, %p36_p2  ;;  %s150_s22 = scalar_lea.sflag [#allocation3], %s149_s5 }
  0x1a   : > { %s792_s23 = sshra.s32 %s160_s16, 4  ;;  %s799_s28 = scalar_lea.hbm %s1126_s0, 16  ;;  %s793_s23 = int_to_ptr.hbm [resolvable:$true] %s792_s23 }
  0x1b   : > { %s794_s24 = scalar_lea.hbm %s793_s23, 8  ;;  %p796_p9 = pneg %p1005_p8 }
  0x1c   : > { %p795_p7 = scmp.ne.s32.totalorder %s793_s23, %s794_s24  ;;  %p800_p0 = scmp.lt.s32.totalorder %s793_s23, %s1126_s0 }
  0x1d   : > { %p801_p2 = scmp.lt.s32.totalorder %s799_s28, %s794_s24 }
  0x1e   : > { %p797_p10 = pnand %p796_p9, %p795_p7 }
  0x1f   : > { %p802_p6 = por %p801_p2, %p800_p0 }
  0x20   : > { %p798_p11 = pneg %p797_p10 }
  0x22   : > { %p803_p5 = pnand %p802_p6, %p798_p11 }
  0x24   : > { %806 = shalt.err (!%p803_p5)
}
  0x25   : > { %687 = dma.hbm_to_vmem [thread:$0]  (!%p1005_p8), %s160_s16, 128, %s162_s18, %s150_s22  }
  0x26   : > { %170 = sbr.rel (%p960_p3) target bundleno = 992 (0x3e0), region = 32  ;;  %s1022_s5 = sand.u32 (!%p960_p3), 1, %s884_s13  }
  0x27   : > { %s646_s9 = sshll.u32 (!%p960_p3), %s1022_s5, 3  ;;  %s173_s10 = scalar_lea.sflag (!%p960_p3), [#allocation3], %s1022_s5 }
  0x28   : > { %s176_s11 = scalar_lea.vmem (!%p960_p3), [#allocation2], %s646_s9 }
  0x2b   : > { %867 = dma.done.wait (%p987_p12), %s173_s10, 128  }
  0x2c   : > { %869 = vsyncadd (%p987_p12), %s173_s10, 4294967168 }
  0x2d   : > { %871 = dma.done.wait (%p41_p1), [#allocation6], 256  }
  0x2e   : > { %873 = vsyncadd (%p41_p1), [#allocation6], 4294967040  ;;  %v671_v0 = vld [vmem:[#allocation5 + $0x8] sm:$0xff]  ;;  %v670_v1 = vld [vmem:[#allocation5] sm:$0xff]  ;;  %vm228_vm0 = vcmask 261120   ;;  %s897_s30 = smov 104  }
  0x2f   : > { %238 = vmatpush.bf16.msra.mxu0 %v671_v0  ;;  %v206_v2 = vld [vmem:[%s176_s11] sm:$0xff]  ;;  %s898_s17 = smov 120   ;;  %s899_s18 = smov 96   ;;  %vm251_vm1 = vcmask 64512   ;;  %vm301_vm2 = vcmask 1043456  }
  0x30   : > { %v207_v3 = vpack.c.bf16 %v206_v2, %v206_v2  ;;  %v745_v4 = vld [vmem:[%s1128_s2] ss:$0 sm:$0xff]  ;;  %s900_s21 = smov 80   ;;  %s901_s22 = smov 72  }
  0x31   : > { %s902_s23 = smov 88   ;;  %s903_s24 = smov 112  }
  0x32   : > { %s904_s25 = smov 64   ;;  %s905_s27 = smov 48  }
  0x33   : > { %239 = vmatpush.bf16.msra.mxu0 %v670_v1  ;;  %s906_s28 = smov 56   ;;  %s907_s7 = smov 40  }
  0x34   : > { %s908_s8 = smov 8   ;;  %s909_s10 = smov 16  }
  0x35   : > { %s910_s11 = smov 24   ;;  %s667_s20 = sshll.u32 %s955_s19, 3 }
  0x36   : > { %657 = vmatmul.msk.bf16.vlgmr.msra.gmra.mxu0 %vm228_vm0, %v207_v3  ;;  %s544_s19 = scalar_lea.sflag [#allocation4], %s1022_s5 }
  0xb3   : > { %v241_v5 = vpop.f32.mrf.mxu0 }
  0xb4   : > { %v242_v6 = vadd.f32 %v745_v4, %v241_v5 }
  0xb6   : > { %v245_v7 = vpack.c.bf16 %v242_v6, %v242_v6 }
  0xb8   : > { %v247_v8 = vunpack.c.l.b16 %v245_v7 }
  0xba   : > { %v1040_v9 = vpack.c.b16 %v247_v8, %v247_v8 }
  0xbb   : > { %v243_v10 = vpop.f32.mrf.mxu0 }
  0xbc   : > { %456 = vrot.lane.b32.xlu2 %v1040_v9, %s897_s30  ;;  %318 = vrot.lane.b32.xlu1 %v1040_v9, %s898_s17  ;;  %s554_s17 = scalar_lea.hbm %s1129_s3, %s667_s20 }
  0xbd   : > { %249 = vrot.lane.b32.xlu0 %v1040_v9, %s899_s18  ;;  %s204_s18 = scalar_lea.vmem [#allocation7], %s646_s9 }
  0xc4   : > { %389 = vrot.lane.b32.xlu2 %v1040_v9, %s900_s21  ;;  %458 = vrot.lane.b32.xlu1 %v1040_v9, %s901_s22  ;;  %s556_s21 = sshll.u32 %s204_s18, 4  ;;  %s558_s22 = sshll.u32 %s554_s17, 4  ;;  %s557_s21 = int_to_ptr.vmem [resolvable:$true] %s556_s21  ;;  %s559_s22 = int_to_ptr.hbm [resolvable:$true] %s558_s22 }
  0xc5   : > { %320 = vrot.lane.b32.xlu0 %v1040_v9, %s902_s23  ;;  %s836_s23 = sshra.s32 %s559_s22, 4  ;;  %s837_s23 = int_to_ptr.hbm [resolvable:$true] %s836_s23 }
  0xc6   : > { %p843_p12 = scmp.lt.s32.totalorder %s837_s23, %s1129_s3 }
  0xcd   : > { %387 = vrot.lane.b32.xlu0 %v1040_v9, %s903_s24  ;;  %s838_s24 = scalar_lea.hbm %s837_s23, 8 }
  0xce   : > { %p839_p1 = scmp.ne.s32.totalorder %s837_s23, %s838_s24 }
  0xd0   : > { %p840_p3 = pnand %p839_p1, %p991_p13 }
  0xd2   : > { %p841_p5 = pneg %p840_p3 }
 0x116   : > { %v457_v11 = vpop.permute.xlu2 %456 }
 0x11e   : > { %v390_v12 = vpop.permute.xlu2 %389 }
 0x11f   : > { %v395_v13 = vsel %vm251_vm1, %v390_v12, 0 }
 0x120   : > { %404 = vmatpush.bf16.xpose.msrb.mxu0 %v395_v13 }
 0x12e   : > { %v319_v14 = vpop.permute.xlu1 %318 }
 0x12f   : > { %v250_v15 = vpop.permute.xlu0 %249 }
 0x130   : > { %v256_v16 = vsel %vm251_vm1, %v250_v15, 0 }
 0x131   : > { %265 = vmatpush.bf16.xpose.msra.mxu1 %v256_v16 }
 0x136   : > { %v459_v17 = vpop.permute.xlu1 %458 }
 0x137   : > { %v321_v18 = vpop.permute.xlu0 %320  ;;  %v464_v19 = vsel %vm251_vm1, %v459_v17, 0 }
 0x138   : > { %658 = vmatmul.msk.bf16.vlgmr.msra.gmra.mxu1 %vm251_vm1, %v245_v7  ;;  %v326_v20 = vsel %vm251_vm1, %v321_v18, 0 }
 0x139   : > { %335 = vmatpush.bf16.xpose.msra.mxu3 %v326_v20 }
 0x13f   : > { %v388_v21 = vpop.permute.xlu0 %387 }
 0x140   : > { %660 = vmatmul.msk.bf16.vlgmr.msra.gmra.mxu3 %vm251_vm1, %v319_v14  ;;  %662 = vmatmul.msk.bf16.vlgmr.msrb.gmra.mxu0 %vm251_vm1, %v388_v21 }
 0x141   : > { %473 = vmatpush.bf16.xpose.msrb.mxu3 %v464_v19 }
 0x150   : > { %664 = vmatmul.msk.bf16.vlgmr.msrb.gmra.mxu3 %vm251_vm1, %v457_v11 }
 0x1b5   : > { %v267_v22 = vpop.f32.mrf.mxu1 }
 0x1b6   : > { %v271_v23 = vsel %vm251_vm1, %v267_v22, -inf }
 0x1b7   : > { %272 = vmax.xlane.f32.xlu1 %v271_v23 }
 0x1bd   : > { %v269_v24 = vpop.f32.mrf.mxu1  ;;  %v406_v25 = vpop.f32.mrf.mxu0 }
 0x1be   : > { %v410_v30 = vsel %vm251_vm1, %v406_v25, -inf }
 0x1c3   : > { %v337_v26 = vpop.f32.mrf.mxu3 }
 0x1c4   : > { %v341_v27 = vsel %vm251_vm1, %v337_v26, -inf }
 0x1c5   : > { %342 = vmax.xlane.f32.xlu2 %v341_v27  ;;  %v408_v28 = vpop.f32.mrf.mxu0 }
 0x1cb   : > { %v339_v29 = vpop.f32.mrf.mxu3 }
 0x1cd   : > { %411 = vmax.xlane.f32.xlu2 %v410_v30 }
 0x1d3   : > { %v475_v31 = vpop.f32.mrf.mxu3 }
 0x1d4   : > { %v479_v32 = vsel %vm251_vm1, %v475_v31, -inf }
 0x1d5   : > { %480 = vmax.xlane.f32.xlu0 %v479_v32 }
 0x1db   : > { %v477_v33 = vpop.f32.mrf.mxu3 }
 0x1e9   : > { %296 = vrot.lane.b32.xlu0 %v1040_v9, %s904_s25 }
 0x1f1   : > { %435 = vrot.lane.b32.xlu0 %v1040_v9, %s905_s27  ;;  %s842_s27 = scalar_lea.hbm %s1129_s3, 16 }
 0x1f2   : > { %p844_p8 = scmp.lt.s32.totalorder %s842_s27, %s838_s24 }
 0x1f4   : > { %p845_p7 = por %p844_p8, %p843_p12 }
 0x1f6   : > { %p846_p9 = pnand %p845_p7, %p841_p5 }
 0x22a   : > { %v273_v34 = vpop.xlane.xlu1 %272 }
 0x22b   : > { %v274_v35 = vsub.f32 %v267_v22, %v273_v34 }
 0x22d   : > { %v275_v36 = vmul.f32 1.442695, %v274_v35 }
 0x22f   : > { %746 = vpow2.f32 %v275_v36 }
 0x235   : > { %v747_v37 = vpop.eup %746 }
 0x236   : > { %v277_v38 = vsel %vm251_vm1, %v747_v37, 0.0 }
 0x237   : > { %278 = vadd.xlane.f32.xlu1 %v277_v38 }
 0x238   : > { %v343_v39 = vpop.xlane.xlu2 %342 }
 0x239   : > { %v344_v40 = vsub.f32 %v337_v26, %v343_v39 }
 0x23b   : > { %v345_v41 = vmul.f32 1.442695, %v344_v40 }
 0x23d   : > { %748 = vpow2.f32 %v345_v41 }
 0x240   : > { %v412_v42 = vpop.xlane.xlu2 %411 }
 0x241   : > { %v413_v43 = vsub.f32 %v406_v25, %v412_v42 }
 0x243   : > { %v1064_v44 = vpop.eup %748  ;;  %v414_v45 = vmul.f32 1.442695, %v413_v43 }
 0x244   : > { %v347_v46 = vsel %vm251_vm1, %v1064_v44, 0.0 }
 0x245   : > { %750 = vpow2.f32 %v414_v45  ;;  %348 = vadd.xlane.f32.xlu2 %v347_v46 }
 0x248   : > { %v481_v47 = vpop.xlane.xlu0 %480 }
 0x249   : > { %v482_v48 = vsub.f32 %v475_v31, %v481_v47 }
 0x24b   : > { %v1068_v49 = vpop.eup %750  ;;  %v483_v50 = vmul.f32 1.442695, %v482_v48 }
 0x24c   : > { %v416_v51 = vsel %vm251_vm1, %v1068_v49, 0.0 }
 0x24d   : > { %752 = vpow2.f32 %v483_v50  ;;  %417 = vadd.xlane.f32.xlu1 %v416_v51 }
 0x253   : > { %v1072_v52 = vpop.eup %752 }
 0x254   : > { %v485_v53 = vsel %vm251_vm1, %v1072_v52, 0.0 }
 0x255   : > { %486 = vadd.xlane.f32.xlu1 %v485_v53 }
 0x25b   : > { %v297_v54 = vpop.permute.xlu0 %296 }
 0x25c   : > { %v303_v55 = vsel %vm301_vm2, %v297_v54, 0 }
 0x25d   : > { %366 = vrot.lane.b32.xlu2 %v1040_v9, %s906_s28  ;;  %312 = vmatpush.bf16.msra.mxu2 %v303_v55 }
 0x263   : > { %v436_v56 = vpop.permute.xlu0 %435 }
 0x264   : > { %v441_v57 = vsel %vm301_vm2, %v436_v56, 0 }
 0x265   : > { %450 = vmatpush.bf16.msrb.mxu1 %v441_v57 }
 0x26e   : > { %504 = vrot.lane.b32.xlu1 %v1040_v9, %s907_s7 }
 0x2aa   : > { %v279_v58 = vpop.xlane.xlu1 %278 }
 0x2ab   : > { %754 = vrcp.f32 %v279_v58  ;;  %v291_v62 = vand.u32 2147483648, %v279_v58  ;;  %v289_v0 = vand.u32 2147483647, %v279_v58  ;;  %vm285_vm4 = vweird.f32 %v279_v58 }
 0x2ad   : > { %v292_v3 = vor.u32 1.1754944e-38, %v291_v62  ;;  %vm290_vm6 = vcmp.eq.f32.partialorder %v289_v0, 8.507059e+37 }
 0x2b1   : > { %v755_v59 = vpop.eup %754 }
 0x2b2   : > { %v281_v60 = vmul.f32 %v755_v59, %v279_v58  ;;  %vm286_vm3 = vweird.f32 %v755_v59 }
 0x2b3   : > { %vm287_vm5 = vmor %vm285_vm4, %vm286_vm3 }
 0x2b4   : > { %v282_v61 = vsub.f32 1.0, %v281_v60 }
 0x2b6   : > { %v283_v63 = vmul.f32 %v755_v59, %v282_v61 }
 0x2b8   : > { %v349_v1 = vpop.xlane.xlu2 %348  ;;  %v284_v2 = vadd.f32 %v755_v59, %v283_v63 }
 0x2b9   : > { %756 = vrcp.f32 %v349_v1  ;;  %v361_v15 = vand.u32 2147483648, %v349_v1  ;;  %v359_v16 = vand.u32 2147483647, %v349_v1  ;;  %vm355_vm8 = vweird.f32 %v349_v1 }
 0x2ba   : > { %v288_v4 = vsel %vm287_vm5, %v755_v59, %v284_v2 }
 0x2bb   : > { %v293_v5 = vsel %vm290_vm6, %v292_v3, %v288_v4  ;;  %v362_v19 = vor.u32 1.1754944e-38, %v361_v15  ;;  %vm360_vm10 = vcmp.eq.f32.partialorder %v359_v16, 8.507059e+37  ;;  %vm540_vm6 = vcmask 195584  }
 0x2bc   : > { %v294_v6 = vmul.f32 %v747_v37, %v293_v5 }
 0x2be   : > { %v295_v7 = vpack.c.bf16 %v294_v6, %v294_v6 }
 0x2bf   : > { %v757_v8 = vpop.eup %756 }
 0x2c0   : > { %v351_v9 = vmul.f32 %v757_v8, %v349_v1  ;;  %v418_v10 = vpop.xlane.xlu1 %417  ;;  %v367_v11 = vpop.permute.xlu2 %366  ;;  %659 = vmatmul.msk.bf16.vlgmr.msra.gmra.mxu2 %vm251_vm1, %v295_v7  ;;  %vm356_vm7 = vweird.f32 %v757_v8 }
 0x2c1   : > { %758 = vrcp.f32 %v418_v10  ;;  %v372_v13 = vsel %vm301_vm2, %v367_v11, 0  ;;  %vm357_vm9 = vmor %vm355_vm8, %vm356_vm7  ;;  %v430_v25 = vand.u32 2147483648, %v418_v10  ;;  %v428_v28 = vand.u32 2147483647, %v418_v10 }
 0x2c2   : > { %v352_v12 = vsub.f32 1.0, %v351_v9  ;;  %381 = vmatpush.bf16.msrb.mxu2 %v372_v13  ;;  %vm424_vm12 = vweird.f32 %v418_v10 }
 0x2c3   : > { %v431_v32 = vor.u32 1.1754944e-38, %v430_v25  ;;  %vm429_vm14 = vcmp.eq.f32.partialorder %v428_v28, 8.507059e+37 }
 0x2c4   : > { %v353_v14 = vmul.f32 %v757_v8, %v352_v12 }
 0x2c6   : > { %v354_v17 = vadd.f32 %v757_v8, %v353_v14 }
 0x2c7   : > { %v759_v18 = vpop.eup %758 }
 0x2c8   : > { %v420_v20 = vmul.f32 %v759_v18, %v418_v10  ;;  %v487_v21 = vpop.xlane.xlu1 %486  ;;  %v358_v22 = vsel %vm357_vm9, %v757_v8, %v354_v17  ;;  %vm425_vm11 = vweird.f32 %v759_v18 }
 0x2c9   : > { %760 = vrcp.f32 %v487_v21  ;;  %v363_v24 = vsel %vm360_vm10, %v362_v19, %v358_v22  ;;  %vm426_vm13 = vmor %vm424_vm12, %vm425_vm11  ;;  %v499_v41 = vand.u32 2147483648, %v487_v21  ;;  %vm493_vm3 = vweird.f32 %v487_v21 }
 0x2ca   : > { %v421_v23 = vsub.f32 1.0, %v420_v20  ;;  %v364_v26 = vmul.f32 %v1064_v44, %v363_v24  ;;  %v497_v42 = vand.u32 2147483647, %v487_v21 }
 0x2cb   : > { %v500_v44 = vor.u32 1.1754944e-38, %v499_v41 }
 0x2cc   : > { %v422_v27 = vmul.f32 %v759_v18, %v421_v23  ;;  %v365_v30 = vpack.c.bf16 %v364_v26, %v364_v26  ;;  %vm498_vm5 = vcmp.eq.f32.partialorder %v497_v42, 8.507059e+37 }
 0x2ce   : > { %v423_v29 = vadd.f32 %v759_v18, %v422_v27 }
 0x2cf   : > { %v761_v31 = vpop.eup %760 }
 0x2d0   : > { %v489_v33 = vmul.f32 %v761_v31, %v487_v21  ;;  %661 = vmatmul.msk.bf16.vlgmr.msrb.gmra.mxu2 %vm251_vm1, %v365_v30  ;;  %v427_v34 = vsel %vm426_vm13, %v759_v18, %v423_v29  ;;  %vm494_vm15 = vweird.f32 %v761_v31 }
 0x2d1   : > { %v432_v35 = vsel %vm429_vm14, %v431_v32, %v427_v34  ;;  %vm495_vm4 = vmor %vm493_vm3, %vm494_vm15 }
 0x2d2   : > { %v490_v36 = vsub.f32 1.0, %v489_v33  ;;  %v433_v37 = vmul.f32 %v1068_v49, %v432_v35 }
 0x2d4   : > { %v491_v38 = vmul.f32 %v761_v31, %v490_v36  ;;  %v434_v39 = vpack.c.bf16 %v433_v37, %v433_v37 }
 0x2d6   : > { %v492_v40 = vadd.f32 %v761_v31, %v491_v38  ;;  %663 = vmatmul.msk.bf16.vlgmr.msrb.gmra.mxu1 %vm251_vm1, %v434_v39 }
 0x2d8   : > { %v496_v43 = vsel %vm495_vm4, %v761_v31, %v492_v40 }
 0x2d9   : > { %v501_v45 = vsel %vm498_vm5, %v500_v44, %v496_v43 }
 0x2da   : > { %v502_v46 = vmul.f32 %v1072_v52, %v501_v45 }
 0x2dc   : > { %v503_v49 = vpack.c.bf16 %v502_v46, %v502_v46 }
 0x2e0   : > { %v505_v47 = vpop.permute.xlu1 %504 }
 0x2e1   : > { %v510_v48 = vsel %vm301_vm2, %v505_v47, 0  ;;  %vm538_vm2 = vcmask 130048  }
 0x2e2   : > { %519 = vmatpush.bf16.msra.mxu2 %v510_v48 }
 0x2e5   : > { %665 = vmatmul.msk.bf16.vlgmr.msra.gmra.mxu2 %vm251_vm1, %v503_v49 }
 0x343   : > { %v314_v50 = vpop.f32.mrf.mxu2 }
 0x34b   : > { %v316_v51 = vpop.f32.mrf.mxu2 }
 0x353   : > { %v383_v53 = vpop.f32.mrf.mxu2  ;;  %v452_v54 = vpop.f32.mrf.mxu1 }
 0x354   : > { %526 = vrot.lane.b32.xlu0 %v383_v53, %s908_s8  ;;  %530 = vrot.lane.b32.xlu2 %v452_v54, %s909_s10 }
 0x35b   : > { %v385_v55 = vpop.f32.mrf.mxu2  ;;  %v454_v56 = vpop.f32.mrf.mxu1 }
 0x368   : > { %v521_v52 = vpop.f32.mrf.mxu2 }
 0x369   : > { %534 = vrot.lane.b32.xlu0 %v521_v52, %s910_s11 }
 0x370   : > { %v523_v57 = vpop.f32.mrf.mxu2 }
 0x3ae   : > { %v531_v60 = vpop.permute.xlu2 %530 }
 0x3c6   : > { %v527_v58 = vpop.permute.xlu0 %526 }
 0x3c7   : > { %v537_v59 = vsel %vm251_vm1, %v314_v50, %v527_v58 }
 0x3c8   : > { %v539_v61 = vsel %vm538_vm2, %v537_v59, %v531_v60 }
 0x3db   : > { %v535_v62 = vpop.permute.xlu0 %534 }
 0x3dc   : > { %v541_v63 = vsel %vm540_vm6, %v539_v61, %v535_v62 }
 0x3dd   : > { %542 = vst.msk [vmem:[%s204_s18] sm:$0xff] %vm228_vm0, %v541_v63 }
 0x3de   : > { %849 = shalt.err (!%p846_p9)
}
 0x3df   : > { %678 = dma.vmem_to_hbm [thread:$0]  (%p991_p13), %s557_s21, 128, %s559_s22, %s544_s19  }
 0x3e0 PF: > { %s570_s5 = sand.u32 1, %s880_s12   ;;  %p1135_p10 = scmp.ge.s32.totalorder %s892_s15, 2 }
 0x3e1   : > { %s571_s8 = scalar_lea.sflag [#allocation4], %s570_s5 }
 0x3e2   : > { %p689_p11 = pnand %p1135_p10, %p996_p4 }
 0x3e4   : > { %p690_p0 = pneg %p689_p11 }
 0x3e6   : > { %875 = dma.done.wait (%p690_p0), %s571_s8, 128  }
 0x3e7   : > { %877 = vsyncadd (%p690_p0), %s571_s8, 4294967168  ;;  %p17_p2 = scmp.ge.s32.totalorder %s971_s26, 4   ;;  %s1136_s12 = smov %s884_s13 }
 0x3e8   : > { %s1137_s13 = smov %s888_s14  ;;  %s1138_s14 = smov %s983_s29 }
 0x3e9   : > { %s1139_s15 = smov %s971_s26  ;;  %19 = sbr.rel (!%p17_p2) target bundleno = 6 (0x6), region = 81 }
 0x3ee   :  { %577 = vsyncpa [#allocation3], 1 }
 0x3ef   :  { %579 = vsyncpa [#allocation3 + $0x1], 1 }
 0x3f0   :  { %580 = vsyncpa [#allocation6], 1 }
 0x3f1   :  { %581 = vsyncpa [#allocation4], 1 }
 0x3f2   :  { %583 = vsyncpa [#allocation4 + $0x1], 1 }

</bundles_post_ra>
